<compile_context>
chip_gen: v5e
topology: v5e:2x2
jax: 0.10.0
libtpu: 0.0.40
codegen_flags: <defaults>
</compile_context>

<pallas_src>
import numpy as np
import jax
import jax.numpy as jnp
from jax import lax
from jax.experimental import pallas as pl
from jax.experimental.pallas import tpu as pltpu


def _round_up(v, m):
    return ((v + m - 1) // m) * m


def to_csc(edge_index, size=None):
    """numpy equivalent of CuGraphModule.to_csc (no edge_attr)."""
    edge_index = np.asarray(edge_index)
    row, col = edge_index[0], edge_index[1]
    if size is None:
        num_src = num_dst = int(edge_index.max()) + 1
    else:
        num_src, num_dst = size
    perm = np.argsort(col, kind="stable")
    row_sorted = row[perm].astype(np.int32)
    counts = np.bincount(col, minlength=num_dst)
    colptr = np.zeros(num_dst + 1, dtype=np.int32)
    colptr[1:] = np.cumsum(counts)
    return row_sorted, colptr, num_src


def _make_agg_kernel(TD, TS, TE):
    def kernel(cnt_ref,                 # SMEM: [n_tiles] int32, #active edge chunks per dst tile
               dst_ref,                 # VMEM: [1, TE]  int32, local dst id per edge (-1 = pad)
               src_ref,                 # VMEM: [TE, 1]  int32, source node id per edge
               x_ref,                   # VMEM: [TS, F_pad] source feature block
               out_ref,                 # VMEM: [TD, F_pad] output tile
               sel_ref,                 # scratch: [TD, TS] f32 selection/count matrix
               acc_ref):                # scratch: [TD, F_pad] f32 accumulator
        i = pl.program_id(0)            # dst tile
        k = pl.program_id(1)            # src block
        j = pl.program_id(2)            # edge chunk within dst tile
        nk = pl.num_programs(1)
        nj = pl.num_programs(2)

        @pl.when((k == 0) & (j == 0))
        def _init_acc():
            acc_ref[...] = jnp.zeros_like(acc_ref)

        @pl.when(j == 0)
        def _init_sel():
            sel_ref[...] = jnp.zeros_like(sel_ref)

        # Skip fully padded edge chunks (dynamic degree: padded work contributes
        # nothing anyway, this just saves the matmul).
        @pl.when(j < cnt_ref[i])
        def _accumulate_sel():
            src = src_ref[...]                                     # [TE, 1]
            dst = dst_ref[...]                                     # [1, TE]
            s_iota = lax.broadcasted_iota(jnp.int32, (TE, TS), 1) + k * TS
            d_iota = lax.broadcasted_iota(jnp.int32, (TD, TE), 0)
            onehot_src = jnp.where(src == s_iota, 1.0, 0.0).astype(jnp.bfloat16)  # [TE,TS]
            onehot_dst = jnp.where(dst == d_iota, 1.0, 0.0).astype(jnp.bfloat16)  # [TD,TE]
            # sel[d, s] += #edges in this chunk from src (k*TS+s) to dst (i*TD+d)
            sel_ref[...] += jnp.dot(onehot_dst, onehot_src,
                                    preferred_element_type=jnp.float32)

        @pl.when(j == nj - 1)
        def _apply_src_block():
            acc_ref[...] += jnp.dot(sel_ref[...].astype(x_ref.dtype), x_ref[...],
                                    preferred_element_type=jnp.float32)

        @pl.when((k == nk - 1) & (j == nj - 1))
        def _write_out():
            out_ref[...] = acc_ref[...].astype(out_ref.dtype)

    return kernel


def cugraph_aggregate(x, csc, max_num_neighbors=None, *,
                      tile_dst=128, tile_src=128, tile_edge=128):
    """CSC neighbor-sum aggregation (the CuGraph conv hot path).

    x:   [num_src_nodes, F]
    csc: (row [E] int32 sorted by dst, colptr [num_dst+1] int32, num_src_nodes)
    max_num_neighbors: accepted for API parity; not needed here (no edges are dropped).
    """
    del max_num_neighbors
    row, colptr, num_src = csc
    row = np.asarray(row).astype(np.int32)
    colptr = np.asarray(colptr).astype(np.int64)
    num_dst = colptr.shape[0] - 1
    feat = x.shape[1]
    assert x.shape[0] == num_src

    TD, TS, TE = tile_dst, tile_src, tile_edge
    num_dst_pad = max(_round_up(num_dst, TD), TD)
    num_src_pad = max(_round_up(num_src, TS), TS)
    f_pad = max(_round_up(feat, 128), 128)          # lane-dense feature dim
    n_tiles = num_dst_pad // TD
    n_src_blocks = num_src_pad // TS

    # ---- host-side layout plumbing: group edges by dst tile, pad per tile ----
    colptr_pad = np.concatenate(
        [colptr, np.full(num_dst_pad - num_dst, colptr[-1], dtype=colptr.dtype)])
    tile_start = colptr_pad[np.arange(n_tiles) * TD]
    tile_end = colptr_pad[(np.arange(n_tiles) + 1) * TD]
    edges_per_tile = (tile_end - tile_start).astype(np.int64)
    max_e = int(edges_per_tile.max()) if n_tiles else 0
    ept = max(_round_up(max_e, TE), TE)             # padded edges per dst tile
    n_chunks = ept // TE

    dst_of_edge = np.repeat(np.arange(num_dst, dtype=np.int32), np.diff(colptr))
    src_tiled = np.zeros((n_tiles, ept), dtype=np.int32)      # pad -> src 0 (masked out)
    dst_tiled = np.full((n_tiles, ept), -1, dtype=np.int32)   # pad -> no destination
    for t in range(n_tiles):
        s, e = int(tile_start[t]), int(tile_end[t])
        n = e - s
        if n:
            src_tiled[t, :n] = row[s:e]
            dst_tiled[t, :n] = dst_of_edge[s:e] - t * TD
    chunk_counts = jnp.asarray(((edges_per_tile + TE - 1) // TE).astype(np.int32))

    src_col = jnp.asarray(src_tiled.reshape(n_tiles * ept, 1))   # column layout
    dst_row = jnp.asarray(dst_tiled.reshape(1, n_tiles * ept))   # row layout

    x_pad = jnp.zeros((num_src_pad, f_pad), dtype=x.dtype).at[:num_src, :feat].set(x)

    grid = (n_tiles, n_src_blocks, n_chunks)
    kernel = _make_agg_kernel(TD, TS, TE)

    itemsize = jnp.dtype(x.dtype).itemsize
    flops = (2 * n_tiles * n_src_blocks * n_chunks * TD * TE * TS
             + 2 * n_tiles * n_src_blocks * TD * TS * f_pad)
    bytes_accessed = (n_tiles * n_src_blocks * TS * f_pad * itemsize
                      + n_tiles * n_src_blocks * n_chunks * TE * 4 * 2
                      + num_dst_pad * f_pad * itemsize)

    out_pad = pl.pallas_call(
        kernel,
        out_shape=jax.ShapeDtypeStruct((num_dst_pad, f_pad), x.dtype),
        grid_spec=pltpu.PrefetchScalarGridSpec(
            num_scalar_prefetch=1,                               # chunk_counts -> SMEM
            grid=grid,
            in_specs=[
                pl.BlockSpec((1, TE),
                             lambda i, k, j, cnt: (0, i * n_chunks + j)),   # dst ids
                pl.BlockSpec((TE, 1),
                             lambda i, k, j, cnt: (i * n_chunks + j, 0)),   # src ids
                pl.BlockSpec((TS, f_pad),
                             lambda i, k, j, cnt: (k, 0)),                  # x block
            ],
            out_specs=pl.BlockSpec((TD, f_pad),
                                   lambda i, k, j, cnt: (i, 0)),
            scratch_shapes=[
                pltpu.VMEM((TD, TS), jnp.float32),      # sel
                pltpu.VMEM((TD, f_pad), jnp.float32),   # acc
            ],
        ),
        compiler_params=pltpu.CompilerParams(
            dimension_semantics=("parallel", "arbitrary", "arbitrary"),
        ),
        cost_estimate=pl.CostEstimate(
            flops=int(flops), transcendentals=0,
            bytes_accessed=int(bytes_accessed)),
    )(chunk_counts, dst_row, src_col, x_pad)

    return out_pad[:num_dst, :feat]


# TODO(synk): get_cugraph / get_typed_cugraph build pylibcugraphops graph handles
# (make_fg_csr / make_mfg_csr_hg); there is no Pallas equivalent for those opaque
# GPU graph objects — the CSC tuple itself is consumed directly by the kernel.


if __name__ == "__main__":
    key = jax.random.PRNGKey(0)

    num_nodes = 256      # num_src_nodes == num_dst_nodes (non-bipartite)
    feat = 64
    num_edges = 2048

    k1, k2 = jax.random.split(key)
    edge_index = np.asarray(
        jax.random.randint(k1, (2, num_edges), 0, num_nodes), dtype=np.int64)
    x = jax.random.normal(k2, (num_nodes, feat), dtype=jnp.float32)

    # CSC conversion (glue, mirrors CuGraphModule.to_csc)
    csc = to_csc(edge_index, size=(num_nodes, num_nodes))

    out = cugraph_aggregate(x, csc)
    out = jax.block_until_ready(out)

    # Pure-JAX reference: segment-sum of source features over destination nodes.
    ref = jnp.zeros((num_nodes, feat), jnp.float32).at[
        jnp.asarray(edge_index[1])
    ].add(x[jnp.asarray(edge_index[0])])
    np.testing.assert_allclose(np.asarray(out), np.asarray(ref), rtol=1e-4, atol=1e-4)

    print("KERNEL_OK")
</pallas_src>

<mosaic_0001>
module attributes {stable_mosaic.version = 11 : i64} {
  func.func @kernel(%arg0: i32, %arg1: i32, %arg2: i32, %arg3: memref<2xi32, #tpu.memory_space<smem>>, %arg4: memref<1x128xi32, #tpu.memory_space<vmem>>, %arg5: memref<128x1xi32, #tpu.memory_space<vmem>>, %arg6: memref<128x128xf32, #tpu.memory_space<vmem>>, %arg7: memref<128x128xf32, #tpu.memory_space<vmem>>, %arg8: memref<128x128xf32, #tpu.memory_space<vmem>>, %arg9: memref<128x128xf32, #tpu.memory_space<vmem>>) attributes {dimension_semantics = [#tpu.dimension_semantics<parallel>, #tpu.dimension_semantics<arbitrary>, #tpu.dimension_semantics<arbitrary>], iteration_bounds = array<i64: 2, 2, 8>, scalar_prefetch = 1 : i64, scratch_operands = 2 : i64, tpu.core_type = #tpu.core_type<tc>, window_params = [{transform_indices = @transform_0, window_bounds = array<i64: 1, 128>}, {transform_indices = @transform_1, window_bounds = array<i64: 128, 1>}, {transform_indices = @transform_2, window_bounds = array<i64: 128, 128>}, {transform_indices = @transform_3, window_bounds = array<i64: 128, 128>}]} {
    %c0_i32 = arith.constant 0 : i32
    %0 = arith.cmpi eq, %arg1, %c0_i32 : i32
    %c0_i32_0 = arith.constant 0 : i32
    %1 = arith.cmpi eq, %arg2, %c0_i32_0 : i32
    %2 = arith.andi %0, %1 : i1
    %3 = arith.extui %2 : i1 to i32
    %c0_i32_1 = arith.constant 0 : i32
    %4 = arith.cmpi ne, %3, %c0_i32_1 : i32
    scf.if %4 {
      %cst = arith.constant 0.000000e+00 : f32
      %21 = vector.broadcast %cst : f32 to vector<128x128xf32>
      %c0 = arith.constant 0 : index
      %c0_8 = arith.constant 0 : index
      %22 = vector.load %arg9[%c0, %c0_8] : memref<128x128xf32, #tpu.memory_space<vmem>>, vector<128x128xf32>
      tpu.vector_store %arg9[%c0, %c0_8], %21 {strides = array<i32>} : memref<128x128xf32, #tpu.memory_space<vmem>>, vector<128x128xf32>,
    } else {
    }
    %c0_i32_2 = arith.constant 0 : i32
    %5 = arith.cmpi eq, %arg2, %c0_i32_2 : i32
    %6 = arith.extui %5 : i1 to i32
    %c0_i32_3 = arith.constant 0 : i32
    %7 = arith.cmpi ne, %6, %c0_i32_3 : i32
    scf.if %7 {
      %cst = arith.constant 0.000000e+00 : f32
      %21 = vector.broadcast %cst : f32 to vector<128x128xf32>
      %c0 = arith.constant 0 : index
      %c0_8 = arith.constant 0 : index
      %22 = vector.load %arg8[%c0, %c0_8] : memref<128x128xf32, #tpu.memory_space<vmem>>, vector<128x128xf32>
      tpu.vector_store %arg8[%c0, %c0_8], %21 {strides = array<i32>} : memref<128x128xf32, #tpu.memory_space<vmem>>, vector<128x128xf32>,
    } else {
    }
    %8 = arith.index_cast %arg0 : i32 to index
    %9 = memref.load %arg3[%8] : memref<2xi32, #tpu.memory_space<smem>>
    %10 = arith.cmpi slt, %arg2, %9 : i32
    %11 = arith.extui %10 : i1 to i32
    %c0_i32_4 = arith.constant 0 : i32
    %12 = arith.cmpi ne, %11, %c0_i32_4 : i32
    scf.if %12 {
      %c0 = arith.constant 0 : index
      %c0_8 = arith.constant 0 : index
      %21 = vector.load %arg5[%c0, %c0_8] : memref<128x1xi32, #tpu.memory_space<vmem>>, vector<128x1xi32>
      %c0_9 = arith.constant 0 : index
      %c0_10 = arith.constant 0 : index
      %22 = vector.load %arg4[%c0_9, %c0_10] : memref<1x128xi32, #tpu.memory_space<vmem>>, vector<1x128xi32>
      %23 = tpu.iota {dimensions = array<i32: 1>} : vector<128x128xi32>
      %c128_i32 = arith.constant 128 : i32
      %24 = arith.muli %arg1, %c128_i32 : i32
      %25 = vector.broadcast %24 : i32 to vector<128x128xi32>
      %26 = arith.addi %23, %25 : vector<128x128xi32>
      %27 = tpu.iota {dimensions = array<i32: 0>} : vector<128x128xi32>
      %28 = vector.broadcast %21 : vector<128x1xi32> to vector<128x128xi32>
      %29 = arith.cmpi eq, %28, %26 : vector<128x128xi32>
      %cst = arith.constant 1.000000e+00 : f32
      %cst_11 = arith.constant 0.000000e+00 : f32
      %30 = vector.broadcast %cst : f32 to vector<128x128xf32>
      %31 = vector.broadcast %cst_11 : f32 to vector<128x128xf32>
      %32 = arith.select %29, %30, %31 : vector<128x128xi1>, vector<128x128xf32>
      %33 = arith.truncf %32 : vector<128x128xf32> to vector<128x128xbf16>
      %34 = vector.broadcast %22 : vector<1x128xi32> to vector<128x128xi32>
      %35 = arith.cmpi eq, %34, %27 : vector<128x128xi32>
      %cst_12 = arith.constant 1.000000e+00 : f32
      %cst_13 = arith.constant 0.000000e+00 : f32
      %36 = vector.broadcast %cst_12 : f32 to vector<128x128xf32>
      %37 = vector.broadcast %cst_13 : f32 to vector<128x128xf32>
      %38 = arith.select %35, %36, %37 : vector<128x128xi1>, vector<128x128xf32>
      %39 = arith.truncf %38 : vector<128x128xf32> to vector<128x128xbf16>
      %c0_14 = arith.constant 0 : index
      %c0_15 = arith.constant 0 : index
      %40 = vector.load %arg8[%c0_14, %c0_15] : memref<128x128xf32, #tpu.memory_space<vmem>>, vector<128x128xf32>
      %cst_16 = arith.constant dense<0.000000e+00> : vector<128x128xf32>
      %41 = tpu.matmul %39, %33, %cst_16 {dimension_numbers = #tpu.dot_dimension_numbers<[1], [0], [0], [1], [0, 0, 1, 1], [], []>} : vector<128x128xbf16>, vector<128x128xbf16>, vector<128x128xf32> -> vector<128x128xf32>
      %42 = arith.addf %40, %41 : vector<128x128xf32>
      %c0_17 = arith.constant 0 : index
      %c0_18 = arith.constant 0 : index
      %43 = vector.load %arg8[%c0_17, %c0_18] : memref<128x128xf32, #tpu.memory_space<vmem>>, vector<128x128xf32>
      tpu.vector_store %arg8[%c0_17, %c0_18], %42 {strides = array<i32>} : memref<128x128xf32, #tpu.memory_space<vmem>>, vector<128x128xf32>,
    } else {
    }
    %c7_i32 = arith.constant 7 : i32
    %13 = arith.cmpi eq, %arg2, %c7_i32 : i32
    %14 = arith.extui %13 : i1 to i32
    %c0_i32_5 = arith.constant 0 : i32
    %15 = arith.cmpi ne, %14, %c0_i32_5 : i32
    scf.if %15 {
      %c0 = arith.constant 0 : index
      %c0_8 = arith.constant 0 : index
      %21 = vector.load %arg9[%c0, %c0_8] : memref<128x128xf32, #tpu.memory_space<vmem>>, vector<128x128xf32>
      %c0_9 = arith.constant 0 : index
      %c0_10 = arith.constant 0 : index
      %22 = vector.load %arg8[%c0_9, %c0_10] : memref<128x128xf32, #tpu.memory_space<vmem>>, vector<128x128xf32>
      %c0_11 = arith.constant 0 : index
      %c0_12 = arith.constant 0 : index
      %23 = vector.load %arg6[%c0_11, %c0_12] : memref<128x128xf32, #tpu.memory_space<vmem>>, vector<128x128xf32>
      %cst = arith.constant dense<0.000000e+00> : vector<128x128xf32>
      %24 = tpu.matmul %22, %23, %cst {dimension_numbers = #tpu.dot_dimension_numbers<[1], [0], [0], [1], [0, 0, 1, 1], [], []>} : vector<128x128xf32>, vector<128x128xf32>, vector<128x128xf32> -> vector<128x128xf32>
      %25 = arith.addf %21, %24 : vector<128x128xf32>
      %c0_13 = arith.constant 0 : index
      %c0_14 = arith.constant 0 : index
      %26 = vector.load %arg9[%c0_13, %c0_14] : memref<128x128xf32, #tpu.memory_space<vmem>>, vector<128x128xf32>
      tpu.vector_store %arg9[%c0_13, %c0_14], %25 {strides = array<i32>} : memref<128x128xf32, #tpu.memory_space<vmem>>, vector<128x128xf32>,
    } else {
    }
    %c1_i32 = arith.constant 1 : i32
    %16 = arith.cmpi eq, %arg1, %c1_i32 : i32
    %c7_i32_6 = arith.constant 7 : i32
    %17 = arith.cmpi eq, %arg2, %c7_i32_6 : i32
    %18 = arith.andi %16, %17 : i1
    %19 = arith.extui %18 : i1 to i32
    %c0_i32_7 = arith.constant 0 : i32
    %20 = arith.cmpi ne, %19, %c0_i32_7 : i32
    scf.if %20 {
      %c0 = arith.constant 0 : index
      %c0_8 = arith.constant 0 : index
      %21 = vector.load %arg9[%c0, %c0_8] : memref<128x128xf32, #tpu.memory_space<vmem>>, vector<128x128xf32>
      %c0_9 = arith.constant 0 : index
      %c0_10 = arith.constant 0 : index
      %22 = vector.load %arg7[%c0_9, %c0_10] : memref<128x128xf32, #tpu.memory_space<vmem>>, vector<128x128xf32>
      tpu.vector_store %arg7[%c0_9, %c0_10], %21 {strides = array<i32>} : memref<128x128xf32, #tpu.memory_space<vmem>>, vector<128x128xf32>,
    } else {
    }
    return
  }
  func.func @transform_0(%arg0: i32, %arg1: i32, %arg2: i32, %arg3: memref<2xi32, #tpu.memory_space<smem>>) -> (i32, i32) {
    %c8_i32 = arith.constant 8 : i32
    %0 = arith.muli %arg0, %c8_i32 : i32
    %1 = arith.addi %0, %arg2 : i32
    %c0_i32 = arith.constant 0 : i32
    %c0_i32_0 = arith.constant 0 : i32
    return %c0_i32, %1 : i32, i32
  }
  func.func @transform_1(%arg0: i32, %arg1: i32, %arg2: i32, %arg3: memref<2xi32, #tpu.memory_space<smem>>) -> (i32, i32) {
    %c8_i32 = arith.constant 8 : i32
    %0 = arith.muli %arg0, %c8_i32 : i32
    %1 = arith.addi %0, %arg2 : i32
    %c0_i32 = arith.constant 0 : i32
    %c0_i32_0 = arith.constant 0 : i32
    return %1, %c0_i32 : i32, i32
  }
  func.func @transform_2(%arg0: i32, %arg1: i32, %arg2: i32, %arg3: memref<2xi32, #tpu.memory_space<smem>>) -> (i32, i32) {
    %c0_i32 = arith.constant 0 : i32
    %c0_i32_0 = arith.constant 0 : i32
    return %arg1, %c0_i32 : i32, i32
  }
  func.func @transform_3(%arg0: i32, %arg1: i32, %arg2: i32, %arg3: memref<2xi32, #tpu.memory_space<smem>>) -> (i32, i32) {
    %c0_i32 = arith.constant 0 : i32
    %c0_i32_0 = arith.constant 0 : i32
    return %arg0, %c0_i32 : i32, i32
  }
}

</mosaic_0001>

<bundles_post_ra>
// kernel: tpu_custom_call.1
= control target key start
LH: loop header
LB: loop body
LE: loop exit
PB: predicated region body
PF: predicated region fallthrough
CT: control target
= control target key end

     0   :  { %s1231_s18 = smov [#allocation5]   ;;  %s1552_s0 = inlined_call_operand.vmem [shape: s32[2], index: 0, kind: input, shape index: {}]   ;;  %s1553_s1 = inlined_call_operand.vmem [shape: s32[1,2048], index: 1, kind: input, shape index: {}]   ;;  %s1554_s2 = inlined_call_operand.vmem [shape: s32[2048,1], index: 2, kind: input, shape index: {}]   ;;  %s1555_s3 = inlined_call_operand.vmem [shape: f32[256,128], index: 3, kind: input, shape index: {}]   ;;  %s1556_s4 = inlined_call_operand.hbm [shape: f32[256,128], index: 4, kind: output, shape index: {}]  }
   0x1   :  { %s10_s17 = sshll.u32 %s1552_s0, 4  ;;  %s11_s17 = int_to_ptr.vmem [resolvable:$true] %s10_s17 }
   0x2   :  { %13 = dma.vmem_to_smem %s11_s17, 16, %s1231_s18, [#allocation4] }
   0x3   :  { %1185 = dma.done.wait [#allocation4], 16 }
   0x4   :  { %1186 = vsyncadd [#allocation4], 4294967280 }
   0x5   :  { %16 = sfence }
   0x6   :  { %17 = vsyncpa [#allocation7], 0 }
   0x7   :  { %19 = vsyncpa [#allocation7 + $0x1], 0  ;;  %s1266_s19 = smov 0   ;;  %s1268_s20 = smov 0  }
   0x8   :  { %s1270_s21 = smov 0   ;;  %s1272_s22 = smov 0  }
   0x9   :  { %s1274_s23 = smov 0   ;;  %s1276_s24 = smov 0  }
   0xa   :  { %s1278_s0 = smov 0   ;;  %s1280_s25 = smov 0  }
   0xb   :  { %s1282_s26 = smov 0   ;;  %s1284_s27 = smov 0  }
   0xc LB: > { %1561 = sst [smem:[#allocation10_spill]] %s1221_s25  ;;  %s877_s28 = sadd.s32 4294967295, %s1229_s27   ;;  %s1229_s27 = sphi %s1284_s27, %s25_s27   ;;  %s1225_s26 = sphi %s1282_s26, %s1575_s26   ;;  %s1221_s25 = sphi %s1280_s25, %s1574_s25   ;;  %s1217_s0 = sphi %s1278_s0, %s1580_s0   ;;  %s1213_s24 = sphi %s1276_s24, %s1572_s24   ;;  %s1209_s23 = sphi %s1274_s23, %s1571_s23   ;;  %s1205_s22 = sphi %s1272_s22, %s1579_s22   ;;  %s1201_s21 = sphi %s1270_s21, %s1578_s21   ;;  %s1197_s20 = sphi %s1268_s20, %s1577_s20   ;;  %s1193_s19 = sphi %s1266_s19, %s1576_s19  }
   0xd   : > { %1562 = sst [smem:[#allocation11_spill]] %s1225_s26  ;;  %s878_s29 = sadd.s32 4294967294, %s1229_s27  }
   0xe   : > { %s37_s30 = sadd.s32 1, %s1217_s0  ;;  %s40_s5 = sadd.s32 1, %s1221_s25 }
   0xf   : > { %p38_p0 = scmp.ge.s32.totalorder %s37_s30, 8  ;;  %s44_s6 = sadd.s32 1, %s1225_s26 }
  0x10   : > { %p147_p1 = scmp.ne.s32.totalorder %s1201_s21, %s1197_s20  ;;  %p148_p2 = scmp.eq.s32.totalorder %s877_s28, 31 }
  0x11   : > { %s1582_s30 = smov (%p38_p0, %s37_s30), 0  ;;  %s1584_s5 = smov (!%p38_p0, %s40_s5), %s1221_s25 }
  0x12   : > { %1563 = sst [smem:[#allocation12_spill]] %s1582_s30  ;;  %p153_p3 = scmp.ne.s32.totalorder %s1197_s20, %s1193_s19 }
  0x13   : > { %p42_p4 = scmp.ge.s32.totalorder %s1584_s5, 2  ;;  %p154_p5 = scmp.eq.s32.totalorder %s878_s29, 31 }
  0x14   : > { %p1328_p6 = por %p148_p2, %p147_p1  ;;  %p885_p7 = scmp.ge.s32.totalorder %s1229_s27, 1 }
  0x15   : > { %s1586_s5 = smov (%p42_p4, %s1584_s5), 0  ;;  %s1588_s6 = smov (!%p42_p4, %s44_s6), %s1225_s26 }
  0x16   : > { %1565 = sst [smem:[#allocation13_spill]] %s1586_s5  ;;  %p1336_p8 = por %p154_p5, %p153_p3 }
  0x17   : > { %p204_p9 = scmp.lt.s32.totalorder %s1229_s27, 33  ;;  %p46_p10 = scmp.ge.s32.totalorder %s1588_s6, 2 }
  0x18   : > { %s137_s10 = sadd.s32 1, %s1201_s21 }
  0x19   : > { %p205_p11 = pnand %p885_p7, %p204_p9  ;;  %s1590_s6 = smov (%p46_p10, %s1588_s6), 0 }
  0x1a   : > { %1567 = sst [smem:[#allocation14_spill]] %s1590_s6  ;;  %s134_s9 = ssub.s32 %s1225_s26, %s1590_s6 }
  0x1b   : > { %p135_p12 = scmp.eq.s32.totalorder %s134_s9, 0  ;;  %208 = sbr.rel (%p205_p11) target bundleno = 664 (0x298), region = 32 }
  0x1c   : > { %s1557_s12 = sand.u32 (!%p205_p11), 1, %s1197_s20   ;;  %s887_s13 = sshll.u32 (!%p205_p11), %s1213_s24, 3 }
  0x1d   : > { %s1347_s11 = scalar_select %p135_p12, %s1201_s21, %s137_s10  }
  0x1e   : > { %s886_s14 = sshll.u32 (!%p205_p11), %s1557_s12, 7  ;;  %s241_s15 = sadd.s32 (!%p205_p11), %s1205_s22, %s887_s13 }
  0x1f   : > { %p242_p13 = scmp.lt.s32.totalorder (!%p205_p11), %s241_s15, 15  ;;  %s889_s16 = sshll.u32 (!%p205_p11), %s241_s15, 4 }
  0x20   : > { %s891_s17 = sshll.u32 %s1209_s23, 4  ;;  %p250_p0 = scmp.lt.s32.totalorder %s889_s16, 255 }
  0x21   : > { %s1592_s15 = smov (!%p242_p13, %s241_s15), 15  ;;  %p258_p1 = scmp.lt.s32.totalorder %s891_s17, 31 }
  0x22   : > { %s244_s29 = scalar_lea.vmem %s1553_s1, %s1592_s15  ;;  %p264_p2 = scmp.eq.s32.totalorder %s1209_s23, 0 }
  0x23   : > { %s1594_s16 = smov (!%p250_p0, %s889_s16), 255  ;;  %s1596_s17 = smov (!%p258_p1, %s891_s17), 31 }
  0x24   : > { %s890_s9 = sshll.u32 %s1594_s16, 3  ;;  %p265_p3 = scmp.eq.s32.totalorder %s1205_s22, 0 }
  0x25   : > { %s1366_s13 = scalar_lea.vmem %s1554_s2, %s890_s9  ;;  %s892_s6 = sshll.u32 %s1596_s17, 3 }
  0x26   : > { %s1371_s26 = scalar_lea.vmem %s1555_s3, %s892_s6  ;;  %p266_p4 = pnand %p265_p3, %p264_p2 }
  0x27   : > { %s1373_s25 = scalar_lea.vmem [#allocation6], %s886_s14 }
  0x28   : > { %269 = sbr.rel (%p266_p4) target bundleno = 62 (0x3e), region = 36 }
  0x2d   : > { %v1232_v0 = vmov 0.0  }
  0x2e   : > { %270 = vst [vmem:[#allocation3 + $0x28] sm:$0xff] %v1232_v0 }
  0x2f   : > { %271 = vst [vmem:[#allocation3 + $0x68] sm:$0xff] %v1232_v0 }
  0x30   : > { %272 = vst [vmem:[#allocation3 + $0x10] sm:$0xff] %v1232_v0 }
  0x31   : > { %273 = vst [vmem:[#allocation3 + $0x40] sm:$0xff] %v1232_v0 }
  0x32   : > { %274 = vst [vmem:[#allocation3 + $0x48] sm:$0xff] %v1232_v0 }
  0x33   : > { %275 = vst [vmem:[#allocation3 + $0x30] sm:$0xff] %v1232_v0 }
  0x34   : > { %276 = vst [vmem:[#allocation3 + $0x70] sm:$0xff] %v1232_v0 }
  0x35   : > { %277 = vst [vmem:[#allocation3 + $0x38] sm:$0xff] %v1232_v0 }
  0x36   : > { %278 = vst [vmem:[#allocation3 + $0x20] sm:$0xff] %v1232_v0 }
  0x37   : > { %279 = vst [vmem:[#allocation3 + $0x78] sm:$0xff] %v1232_v0 }
  0x38   : > { %280 = vst [vmem:[#allocation3 + $0x18] sm:$0xff] %v1232_v0 }
  0x39   : > { %281 = vst [vmem:[#allocation3 + $0x58] sm:$0xff] %v1232_v0 }
  0x3a   : > { %282 = vst [vmem:[#allocation3] sm:$0xff] %v1232_v0 }
  0x3b   : > { %283 = vst [vmem:[#allocation3 + $0x8] sm:$0xff] %v1232_v0 }
  0x3c   : > { %284 = vst [vmem:[#allocation3 + $0x60] sm:$0xff] %v1232_v0 }
  0x3d   : > { %285 = vst [vmem:[#allocation3 + $0x50] sm:$0xff] %v1232_v0 }
  0x3e PF: > { %p893_p5 = scmp.ne.s32.totalorder %s1205_s22, 0 }
  0x40   : > { %288 = sbr.rel (%p893_p5) target bundleno = 86 (0x56), region = 40 }
  0x45   : > { %v1233_v1 = vmov 0.0  }
  0x46   : > { %289 = vst [vmem:[#allocation2 + $0x30] sm:$0xff] %v1233_v1 }
  0x47   : > { %290 = vst [vmem:[#allocation2] sm:$0xff] %v1233_v1 }
  0x48   : > { %291 = vst [vmem:[#allocation2 + $0x58] sm:$0xff] %v1233_v1 }
  0x49   : > { %292 = vst [vmem:[#allocation2 + $0x18] sm:$0xff] %v1233_v1 }
  0x4a   : > { %293 = vst [vmem:[#allocation2 + $0x50] sm:$0xff] %v1233_v1 }
  0x4b   : > { %294 = vst [vmem:[#allocation2 + $0x68] sm:$0xff] %v1233_v1 }
  0x4c   : > { %295 = vst [vmem:[#allocation2 + $0x8] sm:$0xff] %v1233_v1 }
  0x4d   : > { %296 = vst [vmem:[#allocation2 + $0x48] sm:$0xff] %v1233_v1 }
  0x4e   : > { %297 = vst [vmem:[#allocation2 + $0x40] sm:$0xff] %v1233_v1 }
  0x4f   : > { %298 = vst [vmem:[#allocation2 + $0x20] sm:$0xff] %v1233_v1 }
  0x50   : > { %299 = vst [vmem:[#allocation2 + $0x10] sm:$0xff] %v1233_v1 }
  0x51   : > { %300 = vst [vmem:[#allocation2 + $0x38] sm:$0xff] %v1233_v1 }
  0x52   : > { %301 = vst [vmem:[#allocation2 + $0x60] sm:$0xff] %v1233_v1 }
  0x53   : > { %302 = vst [vmem:[#allocation2 + $0x70] sm:$0xff] %v1233_v1 }
  0x54   : > { %303 = vst [vmem:[#allocation2 + $0x78] sm:$0xff] %v1233_v1 }
  0x55   : > { %304 = vst [vmem:[#allocation2 + $0x28] sm:$0xff] %v1233_v1 }
  0x56 PF: > { %s305_s30 = sld [smem:[#allocation5 + %s1213_s24]] }
  0x5c   : > { %p894_p7 = scmp.ge.s32.totalorder %s1205_s22, %s305_s30 }
  0x5d   : > { %s895_s5 = sshll.u32 (!%p894_p7), %s1209_s23, 7 }
  0x5e   : > { %309 = sbr.rel (%p894_p7) target bundleno = 423 (0x1a7), region = 44 }
  0x63   : > { %v324_v2 = vld [vmem:[%s1366_s13 + $0x70] sm:$0xff]  ;;  %v322_v3 = vld [vmem:[%s1366_s13 + $0x60] sm:$0xff]  ;;  %v1234_v5 = vmov 0   ;;  %v323_v6 = vld [vmem:[%s1366_s13 + $0x68] sm:$0xff]  ;;  %v327_v19 = vlaneseq  ;;  %v330_v24 = vstv %s895_s5  ;;  %v1235_v29 = vmov 1.0|1.0  }
  0x64   : > { %v320_v4 = vld [vmem:[%s1366_s13 + $0x50] sm:$0xff]  ;;  %1103 = vset.pattern.permute.xlu2 %v1234_v5  ;;  %1102 = vset.pattern.permute.xlu1 %v1234_v5  ;;  %v325_v7 = vld [vmem:[%s1366_s13 + $0x78] sm:$0xff]  ;;  %v319_v9 = vld [vmem:[%s1366_s13 + $0x48] sm:$0xff] }
  0x65   : > { %1101 = vset.pattern.permute.xlu0 %v1234_v5  ;;  %386 = vperm.xlu1 %1102, %v322_v3   ;;  %v321_v8 = vld [vmem:[%s1366_s13 + $0x58] sm:$0xff]  ;;  %v318_v10 = vld [vmem:[%s1366_s13 + $0x40] sm:$0xff]  ;;  %v316_v11 = vld [vmem:[%s1366_s13 + $0x30] sm:$0xff]  ;;  %v328_v23 = vand.u32 127, %v327_v19  ;;  %v333_v36 = vshrl.u32 %v327_v19, 7 }
  0x66   : > { %392 = vperm.xlu0 %1101, %v324_v2   ;;  %380 = vperm.xlu2 %1103, %v320_v4   ;;  %v314_v12 = vld [vmem:[%s1366_s13 + $0x20] sm:$0xff]  ;;  %v317_v13 = vld [vmem:[%s1366_s13 + $0x38] sm:$0xff]  ;;  %v315_v14 = vld [vmem:[%s1366_s13 + $0x28] sm:$0xff] }
  0x67   : > { %v313_v15 = vld [vmem:[%s1366_s13 + $0x18] sm:$0xff]  ;;  %v312_v16 = vld [vmem:[%s1366_s13 + $0x10] sm:$0xff]  ;;  %v310_v17 = vld [vmem:[%s1366_s13] sm:$0xff]  ;;  %v1395_v25 = vadd.s32 %v330_v24, %v328_v23  ;;  %v334_v39 = vadd.s32 8, %v333_v36  ;;  %v337_v41 = vadd.s32 32, %v333_v36  ;;  %v338_v42 = vadd.s32 40, %v333_v36 }
  0x68   : > { %v311_v18 = vld [vmem:[%s1366_s13 + $0x8] sm:$0xff]  ;;  %v1104_v40 = vld [vmem:[%s244_s29] ss:$0 sm:$0xff]  ;;  %v341_v43 = vadd.s32 64, %v333_v36  ;;  %v342_v44 = vadd.s32 72, %v333_v36  ;;  %v345_v45 = vadd.s32 96, %v333_v36 }
  0x69   : > { %v346_v46 = vadd.s32 104, %v333_v36  ;;  %v335_v50 = vadd.s32 16, %v333_v36  ;;  %v336_v51 = vadd.s32 24, %v333_v36  ;;  %v339_v52 = vadd.s32 48, %v333_v36  ;;  %v478_v58 = vld [vmem:[#allocation2 + $0x30] sm:$0xff]  ;;  %v486_v0 = vld [vmem:[#allocation2 + $0x40] sm:$0xff] }
  0x6a   : > { %v340_v53 = vadd.s32 56, %v333_v36  ;;  %v343_v54 = vadd.s32 80, %v333_v36  ;;  %v344_v55 = vadd.s32 88, %v333_v36  ;;  %v347_v56 = vadd.s32 112, %v333_v36  ;;  %v482_v59 = vld [vmem:[#allocation2 + $0x50] sm:$0xff]  ;;  %v490_v1 = vld [vmem:[#allocation2 + $0x60] sm:$0xff] }
  0x6b   : > { %v348_v57 = vadd.s32 120, %v333_v36  ;;  %v479_v2 = vld [vmem:[#allocation2] sm:$0xff]  ;;  %v483_v3 = vld [vmem:[#allocation2 + $0x68] sm:$0xff]  ;;  %v488_v24 = vld [vmem:[#allocation2 + $0x10] sm:$0xff] }
  0x6d   : > { %389 = vperm.xlu1 %1102, %v323_v6  }
  0x6e   : > { %395 = vperm.xlu0 %1101, %v325_v7   ;;  %383 = vperm.xlu2 %1103, %v321_v8  }
  0x75   : > { %377 = vperm.xlu1 %1102, %v319_v9  }
  0x76   : > { %374 = vperm.xlu0 %1101, %v318_v10   ;;  %368 = vperm.xlu2 %1103, %v316_v11  }
  0x7d   : > { %362 = vperm.xlu1 %1102, %v314_v12   ;;  %v487_v12 = vld [vmem:[#allocation2 + $0x20] sm:$0xff] }
  0x7e   : > { %371 = vperm.xlu0 %1101, %v317_v13   ;;  %365 = vperm.xlu2 %1103, %v315_v14   ;;  %v491_v13 = vld [vmem:[#allocation2 + $0x70] sm:$0xff]  ;;  %v480_v14 = vld [vmem:[#allocation2 + $0x58] sm:$0xff] }
  0x85   : > { %359 = vperm.xlu1 %1102, %v313_v15   ;;  %v484_v15 = vld [vmem:[#allocation2 + $0x8] sm:$0xff] }
  0x86   : > { %356 = vperm.xlu0 %1101, %v312_v16   ;;  %350 = vperm.xlu2 %1103, %v310_v17  }
  0x8e   : > { %353 = vperm.xlu0 %1101, %v311_v18  }
  0xc0   : > { %v381_v20 = vpop.permute.xlu2 %380 }
  0xc1   : > { %vm407_vm6 = vcmp.eq.s32.totalorder %v381_v20, %v1395_v25 }
  0xc8   : > { %v384_v27 = vpop.permute.xlu2 %383 }
  0xc9   : > { %vm408_vm7 = vcmp.eq.s32.totalorder %v384_v27, %v1395_v25  ;;  %v485_v27 = vld [vmem:[#allocation2 + $0x48] sm:$0xff] }
  0xca   : > { %vm900_vm8 = vmpackc.low %vm408_vm7, %vm407_vm6  ;;  %vm439_vm6 = vcmp.eq.s32.totalorder %v1104_v40, %v334_v39  ;;  %vm442_vm7 = vcmp.eq.s32.totalorder %v1104_v40, %v337_v41 }
  0xd0   : > { %v369_v32 = vpop.permute.xlu2 %368 }
  0xd1   : > { %vm403_vm12 = vcmp.eq.s32.totalorder %v369_v32, %v1395_v25 }
  0xd7   : > { %v387_v21 = vpop.permute.xlu1 %386 }
  0xd8   : > { %v393_v22 = vpop.permute.xlu0 %392  ;;  %vm409_vm4 = vcmp.eq.s32.totalorder %v387_v21, %v1395_v25  ;;  %v366_v35 = vpop.permute.xlu2 %365 }
  0xd9   : > { %vm411_vm0 = vcmp.eq.s32.totalorder %v393_v22, %v1395_v25 }
  0xdf   : > { %v390_v26 = vpop.permute.xlu1 %389 }
  0xe0   : > { %v396_v28 = vpop.permute.xlu0 %395  ;;  %vm410_vm3 = vcmp.eq.s32.totalorder %v390_v26, %v1395_v25  ;;  %v351_v47 = vpop.permute.xlu2 %350  ;;  %v481_v26 = vld [vmem:[#allocation2 + $0x18] sm:$0xff] }
  0xe1   : > { %vm412_vm1 = vcmp.eq.s32.totalorder %v396_v28, %v1395_v25  ;;  %vm898_vm5 = vmpackc.low %vm410_vm3, %vm409_vm4 }
  0xe2   : > { %vm896_vm2 = vmpackc.low %vm412_vm1, %vm411_vm0  ;;  %vm402_vm0 = vcmp.eq.s32.totalorder %v366_v35, %v1395_v25 }
  0xe3   : > { %897 = vmatpush.bf16.msk.msra.mxu0 %vm896_vm2, %v1235_v29  ;;  %935 = vmatpush.bf16.msk.msra.mxu1 %vm896_vm2, %v1235_v29 }
  0xe4   : > { %936 = vmatpush.bf16.msk.msra.mxu2 %vm896_vm2, %v1235_v29  ;;  %937 = vmatpush.bf16.msk.msra.mxu3 %vm896_vm2, %v1235_v29 }
  0xe7   : > { %899 = vmatpush.bf16.msk.msra.mxu0 %vm898_vm5, %v1235_v29  ;;  %938 = vmatpush.bf16.msk.msra.mxu1 %vm898_vm5, %v1235_v29  ;;  %v378_v30 = vpop.permute.xlu1 %377 }
  0xe8   : > { %939 = vmatpush.bf16.msk.msra.mxu2 %vm898_vm5, %v1235_v29  ;;  %940 = vmatpush.bf16.msk.msra.mxu3 %vm898_vm5, %v1235_v29  ;;  %v375_v31 = vpop.permute.xlu0 %374  ;;  %vm406_vm9 = vcmp.eq.s32.totalorder %v378_v30, %v1395_v25  ;;  %vm438_vm5 = vcmp.eq.s32.totalorder %v1104_v40, %v333_v36  ;;  %v489_v36 = vld [vmem:[#allocation2 + $0x38] sm:$0xff] }
  0xe9   : > { %vm405_vm10 = vcmp.eq.s32.totalorder %v375_v31, %v1395_v25 }
  0xea   : > { %vm902_vm11 = vmpackc.low %vm406_vm9, %vm405_vm10  ;;  %vm446_vm10 = vcmp.eq.s32.totalorder %v1104_v40, %v341_v43 }
  0xeb   : > { %901 = vmatpush.bf16.msk.msra.mxu0 %vm900_vm8, %v1235_v29  ;;  %941 = vmatpush.bf16.msk.msra.mxu1 %vm900_vm8, %v1235_v29  ;;  %vm1444_vm9 = vmpackc.low %vm439_vm6, %vm438_vm5  ;;  %vm441_vm5 = vcmp.eq.s32.totalorder %v1104_v40, %v336_v51  ;;  %vm444_vm6 = vcmp.eq.s32.totalorder %v1104_v40, %v339_v52 }
  0xec   : > { %942 = vmatpush.bf16.msk.msra.mxu2 %vm900_vm8, %v1235_v29  ;;  %943 = vmatpush.bf16.msk.msra.mxu3 %vm900_vm8, %v1235_v29  ;;  %vm443_vm8 = vcmp.eq.s32.totalorder %v1104_v40, %v338_v42 }
  0xef   : > { %903 = vmatpush.bf16.msk.msra.mxu0 %vm902_vm11, %v1235_v29  ;;  %944 = vmatpush.bf16.msk.msra.mxu1 %vm902_vm11, %v1235_v29  ;;  %v363_v33 = vpop.permute.xlu1 %362 }
  0xf0   : > { %945 = vmatpush.bf16.msk.msra.mxu2 %vm902_vm11, %v1235_v29  ;;  %946 = vmatpush.bf16.msk.msra.mxu3 %vm902_vm11, %v1235_v29  ;;  %v372_v34 = vpop.permute.xlu0 %371  ;;  %vm401_vm15 = vcmp.eq.s32.totalorder %v363_v33, %v1395_v25  ;;  %vm447_vm11 = vcmp.eq.s32.totalorder %v1104_v40, %v342_v44 }
  0xf1   : > { %vm404_vm13 = vcmp.eq.s32.totalorder %v372_v34, %v1395_v25  ;;  %vm906_vm1 = vmpackc.low %vm402_vm0, %vm401_vm15  ;;  %vm450_vm15 = vcmp.eq.s32.totalorder %v1104_v40, %v345_v45  ;;  %vm451_vm0 = vcmp.eq.s32.totalorder %v1104_v40, %v346_v46 }
  0xf2   : > { %vm904_vm14 = vmpackc.low %vm404_vm13, %vm403_vm12  ;;  %vm397_vm12 = vcmp.eq.s32.totalorder %v351_v47, %v1395_v25 }
  0xf3   : > { %905 = vmatpush.bf16.msk.msra.mxu0 %vm904_vm14, %v1235_v29  ;;  %947 = vmatpush.bf16.msk.msra.mxu1 %vm904_vm14, %v1235_v29 }
  0xf4   : > { %948 = vmatpush.bf16.msk.msra.mxu2 %vm904_vm14, %v1235_v29  ;;  %949 = vmatpush.bf16.msk.msra.mxu3 %vm904_vm14, %v1235_v29  ;;  %vm916_vm14 = vmpackc.low %vm443_vm8, %vm442_vm7  ;;  %vm445_vm7 = vcmp.eq.s32.totalorder %v1104_v40, %v340_v53  ;;  %vm448_vm8 = vcmp.eq.s32.totalorder %v1104_v40, %v343_v54 }
  0xf7   : > { %907 = vmatpush.bf16.msk.msra.mxu0 %vm906_vm1, %v1235_v29  ;;  %950 = vmatpush.bf16.msk.msra.mxu1 %vm906_vm1, %v1235_v29  ;;  %v360_v37 = vpop.permute.xlu1 %359 }
  0xf8   : > { %951 = vmatpush.bf16.msk.msra.mxu2 %vm906_vm1, %v1235_v29  ;;  %952 = vmatpush.bf16.msk.msra.mxu3 %vm906_vm1, %v1235_v29  ;;  %vm400_vm2 = vcmp.eq.s32.totalorder %v360_v37, %v1395_v25  ;;  %v357_v38 = vpop.permute.xlu0 %356  ;;  %v493_v37 = vld [vmem:[#allocation2 + $0x28] sm:$0xff] }
  0xf9   : > { %vm399_vm3 = vcmp.eq.s32.totalorder %v357_v38, %v1395_v25 }
  0xfa   : > { %vm908_vm4 = vmpackc.low %vm400_vm2, %vm399_vm3 }
  0xfb   : > { %909 = vmatpush.bf16.msk.msra.mxu0 %vm908_vm4, %v1235_v29  ;;  %953 = vmatpush.bf16.msk.msra.mxu1 %vm908_vm4, %v1235_v29  ;;  %vm920_vm2 = vmpackc.low %vm447_vm11, %vm446_vm10  ;;  %vm452_vm11 = vcmp.eq.s32.totalorder %v1104_v40, %v347_v56 }
  0xfc   : > { %954 = vmatpush.bf16.msk.msra.mxu2 %vm908_vm4, %v1235_v29  ;;  %955 = vmatpush.bf16.msk.msra.mxu3 %vm908_vm4, %v1235_v29  ;;  %vm924_vm3 = vmpackc.low %vm451_vm0, %vm450_vm15  ;;  %vm440_vm4 = vcmp.eq.s32.totalorder %v1104_v40, %v335_v50 }
  0xfd   : > { %vm914_vm10 = vmpackc.low %vm441_vm5, %vm440_vm4 }
 0x100   : > { %v354_v48 = vpop.permute.xlu0 %353 }
 0x101   : > { %vm398_vm13 = vcmp.eq.s32.totalorder %v354_v48, %v1395_v25  ;;  %v492_v25 = vld [vmem:[#allocation2 + $0x78] sm:$0xff] }
 0x102   : > { %vm910_vm1 = vmpackc.low %vm398_vm13, %vm397_vm12  ;;  %vm453_vm12 = vcmp.eq.s32.totalorder %v1104_v40, %v348_v57 }
 0x103   : > { %911 = vmatpush.bf16.msk.msra.mxu0 %vm910_vm1, %v1235_v29  ;;  %956 = vmatpush.bf16.msk.msra.mxu1 %vm910_vm1, %v1235_v29  ;;  %vm918_vm13 = vmpackc.low %vm445_vm7, %vm444_vm6 }
 0x104   : > { %957 = vmatpush.bf16.msk.msra.mxu2 %vm910_vm1, %v1235_v29  ;;  %958 = vmatpush.bf16.msk.msra.mxu3 %vm910_vm1, %v1235_v29  ;;  %vm926_vm15 = vmpackc.low %vm453_vm12, %vm452_vm11 }
 0x106   : > { %913 = vmatmul.msk.bf16.vlgmr.msra.gmra.mxu0 %vm1444_vm9, %v1235_v29  ;;  %917 = vmatmul.msk.bf16.vlgmr.msra.gmra.mxu1 %vm916_vm14, %v1235_v29  ;;  %vm449_vm9 = vcmp.eq.s32.totalorder %v1104_v40, %v344_v55 }
 0x107   : > { %921 = vmatmul.msk.bf16.vlgmr.msra.gmra.mxu2 %vm920_vm2, %v1235_v29  ;;  %925 = vmatmul.msk.bf16.vlgmr.msra.gmra.mxu3 %vm924_vm3, %v1235_v29  ;;  %vm922_vm14 = vmpackc.low %vm449_vm9, %vm448_vm8 }
 0x116   : > { %915 = vmatmul.msk.bf16.gmra.mxu0 %vm914_vm10, %v1235_v29  ;;  %919 = vmatmul.msk.bf16.gmra.mxu1 %vm918_vm13, %v1235_v29 }
 0x117   : > { %923 = vmatmul.msk.bf16.gmra.mxu2 %vm922_vm14, %v1235_v29  ;;  %927 = vmatmul.msk.bf16.gmra.mxu3 %vm926_vm15, %v1235_v29 }
 0x183   : > { %v503_v60 = vpop.f32.mrf.mxu0  ;;  %v513_v61 = vpop.f32.mrf.mxu1 }
 0x184   : > { %v543_v62 = vadd.f32 %v503_v60, %v478_v58  ;;  %v547_v63 = vadd.f32 %v513_v61, %v482_v59 }
 0x186   : > { %559 = vst [vmem:[#allocation2 + $0x30] sm:$0xff] %v543_v62 }
 0x187   : > { %563 = vst [vmem:[#allocation2 + $0x50] sm:$0xff] %v547_v63 }
 0x18a   : > { %v523_v4 = vpop.f32.mrf.mxu2  ;;  %v533_v5 = vpop.f32.mrf.mxu3 }
 0x18b   : > { %v551_v6 = vadd.f32 %v523_v4, %v486_v0  ;;  %v555_v7 = vadd.f32 %v533_v5, %v490_v1  ;;  %v505_v8 = vpop.f32.mrf.mxu0  ;;  %v515_v9 = vpop.f32.mrf.mxu1 }
 0x18c   : > { %v544_v10 = vadd.f32 %v505_v8, %v479_v2  ;;  %v548_v11 = vadd.f32 %v515_v9, %v483_v3 }
 0x18d   : > { %567 = vst [vmem:[#allocation2 + $0x40] sm:$0xff] %v551_v6 }
 0x18e   : > { %571 = vst [vmem:[#allocation2 + $0x60] sm:$0xff] %v555_v7 }
 0x18f   : > { %560 = vst [vmem:[#allocation2] sm:$0xff] %v544_v10 }
 0x190   : > { %564 = vst [vmem:[#allocation2 + $0x68] sm:$0xff] %v548_v11 }
 0x192   : > { %v525_v16 = vpop.f32.mrf.mxu2  ;;  %v535_v17 = vpop.f32.mrf.mxu3 }
 0x193   : > { %v552_v18 = vadd.f32 %v525_v16, %v487_v12  ;;  %v556_v19 = vadd.f32 %v535_v17, %v491_v13  ;;  %v508_v20 = vpop.f32.mrf.mxu0  ;;  %v518_v21 = vpop.f32.mrf.mxu1 }
 0x194   : > { %v545_v22 = vadd.f32 %v508_v20, %v480_v14  ;;  %v549_v23 = vadd.f32 %v518_v21, %v484_v15 }
 0x195   : > { %568 = vst [vmem:[#allocation2 + $0x20] sm:$0xff] %v552_v18 }
 0x196   : > { %572 = vst [vmem:[#allocation2 + $0x70] sm:$0xff] %v556_v19 }
 0x197   : > { %561 = vst [vmem:[#allocation2 + $0x58] sm:$0xff] %v545_v22 }
 0x198   : > { %565 = vst [vmem:[#allocation2 + $0x8] sm:$0xff] %v549_v23 }
 0x19a   : > { %v528_v28 = vpop.f32.mrf.mxu2  ;;  %v538_v29 = vpop.f32.mrf.mxu3 }
 0x19b   : > { %v553_v30 = vadd.f32 %v528_v28, %v488_v24  ;;  %v557_v31 = vadd.f32 %v538_v29, %v492_v25  ;;  %v510_v32 = vpop.f32.mrf.mxu0  ;;  %v520_v33 = vpop.f32.mrf.mxu1 }
 0x19c   : > { %v546_v34 = vadd.f32 %v510_v32, %v481_v26  ;;  %v550_v35 = vadd.f32 %v520_v33, %v485_v27 }
 0x19d   : > { %569 = vst [vmem:[#allocation2 + $0x10] sm:$0xff] %v553_v30 }
 0x19e   : > { %573 = vst [vmem:[#allocation2 + $0x78] sm:$0xff] %v557_v31 }
 0x19f   : > { %562 = vst [vmem:[#allocation2 + $0x18] sm:$0xff] %v546_v34 }
 0x1a0   : > { %566 = vst [vmem:[#allocation2 + $0x48] sm:$0xff] %v550_v35 }
 0x1a2   : > { %v530_v38 = vpop.f32.mrf.mxu2  ;;  %v540_v39 = vpop.f32.mrf.mxu3 }
 0x1a3   : > { %v554_v40 = vadd.f32 %v530_v38, %v489_v36  ;;  %v558_v41 = vadd.f32 %v540_v39, %v493_v37 }
 0x1a5   : > { %570 = vst [vmem:[#allocation2 + $0x38] sm:$0xff] %v554_v40 }
 0x1a6   : > { %574 = vst [vmem:[#allocation2 + $0x28] sm:$0xff] %v558_v41 }
 0x1a7 PF: > { %p575_p9 = scmp.eq.s32.totalorder %s1205_s22, 7  ;;  %p928_p10 = scmp.ne.s32.totalorder %s1205_s22, 7 }
 0x1a9   : > { %578 = sbr.rel (%p928_p10) target bundleno = 622 (0x26e), region = 48 }
 0x1ae   : > { %v626_v42 = vld [vmem:[%s1371_s26 + $0x78] sm:$0xff]  ;;  %v625_v43 = vld [vmem:[%s1371_s26 + $0x70] sm:$0xff]  ;;  %v624_v44 = vld [vmem:[%s1371_s26 + $0x68] sm:$0xff] }
 0x1af   : > { %960 = vmatpush.msra.mxu2 %v626_v42  ;;  %961 = vmatpush.msra.mxu3 %v626_v42  ;;  %v623_v45 = vld [vmem:[%s1371_s26 + $0x60] sm:$0xff]  ;;  %v622_v46 = vld [vmem:[%s1371_s26 + $0x58] sm:$0xff]  ;;  %v621_v47 = vld [vmem:[%s1371_s26 + $0x50] sm:$0xff] }
 0x1b0   : > { %627 = vmatpush.msra.mxu0 %v626_v42  ;;  %959 = vmatpush.msra.mxu1 %v626_v42  ;;  %v620_v48 = vld [vmem:[%s1371_s26 + $0x48] sm:$0xff]  ;;  %v619_v49 = vld [vmem:[%s1371_s26 + $0x40] sm:$0xff]  ;;  %v618_v50 = vld [vmem:[%s1371_s26 + $0x38] sm:$0xff] }
 0x1b1   : > { %963 = vmatpush.msra.mxu2 %v625_v43  ;;  %964 = vmatpush.msra.mxu3 %v625_v43  ;;  %v617_v51 = vld [vmem:[%s1371_s26 + $0x30] sm:$0xff]  ;;  %v616_v52 = vld [vmem:[%s1371_s26 + $0x28] sm:$0xff]  ;;  %v615_v53 = vld [vmem:[%s1371_s26 + $0x20] sm:$0xff] }
 0x1b2   : > { %628 = vmatpush.msra.mxu0 %v625_v43  ;;  %962 = vmatpush.msra.mxu1 %v625_v43  ;;  %v614_v54 = vld [vmem:[%s1371_s26 + $0x18] sm:$0xff]  ;;  %v613_v55 = vld [vmem:[%s1371_s26 + $0x10] sm:$0xff]  ;;  %v612_v56 = vld [vmem:[%s1371_s26 + $0x8] sm:$0xff] }
 0x1b3   : > { %966 = vmatpush.msra.mxu2 %v624_v44  ;;  %967 = vmatpush.msra.mxu3 %v624_v44  ;;  %v611_v57 = vld [vmem:[%s1371_s26] sm:$0xff]  ;;  %v595_v60 = vld [vmem:[#allocation2 + $0x30] sm:$0xff]  ;;  %v600_v1 = vld [vmem:[#allocation2 + $0x68] sm:$0xff] }
 0x1b4   : > { %629 = vmatpush.msra.mxu0 %v624_v44  ;;  %965 = vmatpush.msra.mxu1 %v624_v44  ;;  %v603_v58 = vld [vmem:[#allocation2 + $0x40] sm:$0xff]  ;;  %v599_v61 = vld [vmem:[#allocation2 + $0x50] sm:$0xff]  ;;  %v609_v3 = vld [vmem:[#allocation2 + $0x78] sm:$0xff] }
 0x1b5   : > { %969 = vmatpush.msra.mxu2 %v623_v45  ;;  %970 = vmatpush.msra.mxu3 %v623_v45  ;;  %v607_v59 = vld [vmem:[#allocation2 + $0x60] sm:$0xff]  ;;  %v608_v63 = vld [vmem:[#allocation2 + $0x70] sm:$0xff]  ;;  %v597_v4 = vld [vmem:[#allocation2 + $0x58] sm:$0xff] }
 0x1b6   : > { %630 = vmatpush.msra.mxu0 %v623_v45  ;;  %968 = vmatpush.msra.mxu1 %v623_v45  ;;  %v604_v62 = vld [vmem:[#allocation2 + $0x20] sm:$0xff]  ;;  %v605_v2 = vld [vmem:[#allocation2 + $0x10] sm:$0xff]  ;;  %v601_v5 = vld [vmem:[#allocation2 + $0x8] sm:$0xff] }
 0x1b7   : > { %972 = vmatpush.msra.mxu2 %v622_v46  ;;  %973 = vmatpush.msra.mxu3 %v622_v46  ;;  %v596_v0 = vld [vmem:[#allocation2] sm:$0xff]  ;;  %v606_v6 = vld [vmem:[#allocation2 + $0x38] sm:$0xff]  ;;  %v610_v7 = vld [vmem:[#allocation2 + $0x28] sm:$0xff] }
 0x1b8   : > { %631 = vmatpush.msra.mxu0 %v622_v46  ;;  %971 = vmatpush.msra.mxu1 %v622_v46  ;;  %v598_v8 = vld [vmem:[#allocation2 + $0x18] sm:$0xff]  ;;  %v602_v9 = vld [vmem:[#allocation2 + $0x48] sm:$0xff]  ;;  %v587_v16 = vld [vmem:[#allocation3 + $0x20] sm:$0xff] }
 0x1b9   : > { %975 = vmatpush.msra.mxu2 %v621_v47  ;;  %976 = vmatpush.msra.mxu3 %v621_v47  ;;  %v579_v10 = vld [vmem:[#allocation3 + $0x28] sm:$0xff]  ;;  %v591_v17 = vld [vmem:[#allocation3] sm:$0xff]  ;;  %v584_v23 = vld [vmem:[#allocation3 + $0x30] sm:$0xff] }
 0x1ba   : > { %632 = vmatpush.msra.mxu0 %v621_v47  ;;  %974 = vmatpush.msra.mxu1 %v621_v47  ;;  %v583_v11 = vld [vmem:[#allocation3 + $0x48] sm:$0xff]  ;;  %v588_v28 = vld [vmem:[#allocation3 + $0x78] sm:$0xff]  ;;  %v581_v34 = vld [vmem:[#allocation3 + $0x10] sm:$0xff] }
 0x1bb   : > { %978 = vmatpush.msra.mxu2 %v620_v48  ;;  %979 = vmatpush.msra.mxu3 %v620_v48  ;;  %v580_v22 = vld [vmem:[#allocation3 + $0x68] sm:$0xff]  ;;  %v585_v35 = vld [vmem:[#allocation3 + $0x70] sm:$0xff]  ;;  %v589_v40 = vld [vmem:[#allocation3 + $0x18] sm:$0xff] }
 0x1bc   : > { %633 = vmatpush.msra.mxu0 %v620_v48  ;;  %977 = vmatpush.msra.mxu1 %v620_v48  ;;  %v592_v29 = vld [vmem:[#allocation3 + $0x8] sm:$0xff]  ;;  %v593_v41 = vld [vmem:[#allocation3 + $0x60] sm:$0xff]  ;;  %v586_v47 = vld [vmem:[#allocation3 + $0x38] sm:$0xff] }
 0x1bd   : > { %981 = vmatpush.msra.mxu2 %v619_v49  ;;  %982 = vmatpush.msra.mxu3 %v619_v49  ;;  %v582_v46 = vld [vmem:[#allocation3 + $0x40] sm:$0xff] }
 0x1be   : > { %634 = vmatpush.msra.mxu0 %v619_v49  ;;  %980 = vmatpush.msra.mxu1 %v619_v49 }
 0x1bf   : > { %984 = vmatpush.msra.mxu2 %v618_v50  ;;  %985 = vmatpush.msra.mxu3 %v618_v50 }
 0x1c0   : > { %635 = vmatpush.msra.mxu0 %v618_v50  ;;  %983 = vmatpush.msra.mxu1 %v618_v50 }
 0x1c1   : > { %987 = vmatpush.msra.mxu2 %v617_v51  ;;  %988 = vmatpush.msra.mxu3 %v617_v51 }
 0x1c2   : > { %636 = vmatpush.msra.mxu0 %v617_v51  ;;  %986 = vmatpush.msra.mxu1 %v617_v51 }
 0x1c3   : > { %990 = vmatpush.msra.mxu2 %v616_v52  ;;  %991 = vmatpush.msra.mxu3 %v616_v52 }
 0x1c4   : > { %637 = vmatpush.msra.mxu0 %v616_v52  ;;  %989 = vmatpush.msra.mxu1 %v616_v52  ;;  %v590_v52 = vld [vmem:[#allocation3 + $0x58] sm:$0xff] }
 0x1c5   : > { %993 = vmatpush.msra.mxu2 %v615_v53  ;;  %994 = vmatpush.msra.mxu3 %v615_v53 }
 0x1c6   : > { %638 = vmatpush.msra.mxu0 %v615_v53  ;;  %992 = vmatpush.msra.mxu1 %v615_v53  ;;  %v594_v53 = vld [vmem:[#allocation3 + $0x50] sm:$0xff] }
 0x1c7   : > { %996 = vmatpush.msra.mxu2 %v614_v54  ;;  %997 = vmatpush.msra.mxu3 %v614_v54 }
 0x1c8   : > { %639 = vmatpush.msra.mxu0 %v614_v54  ;;  %995 = vmatpush.msra.mxu1 %v614_v54 }
 0x1c9   : > { %999 = vmatpush.msra.mxu2 %v613_v55  ;;  %1000 = vmatpush.msra.mxu3 %v613_v55 }
 0x1ca   : > { %640 = vmatpush.msra.mxu0 %v613_v55  ;;  %998 = vmatpush.msra.mxu1 %v613_v55 }
 0x1cb   : > { %1002 = vmatpush.msra.mxu2 %v612_v56  ;;  %1003 = vmatpush.msra.mxu3 %v612_v56 }
 0x1cc   : > { %641 = vmatpush.msra.mxu0 %v612_v56  ;;  %1001 = vmatpush.msra.mxu1 %v612_v56 }
 0x1cd   : > { %1005 = vmatpush.msra.mxu2 %v611_v57  ;;  %1006 = vmatpush.msra.mxu3 %v611_v57 }
 0x1ce   : > { %667 = vmatmul.f32.vlgmr.msra.gmra.mxu2 %v603_v58  ;;  %679 = vmatmul.f32.vlgmr.msra.gmra.mxu3 %v607_v59 }
 0x1cf   : > { %642 = vmatpush.msra.mxu0 %v611_v57  ;;  %1004 = vmatpush.msra.mxu1 %v611_v57 }
 0x1d0   : > { %643 = vmatmul.f32.vlgmr.msra.gmra.mxu0 %v595_v60  ;;  %655 = vmatmul.f32.vlgmr.msra.gmra.mxu1 %v599_v61 }
 0x1d6   : > { %670 = vmatmul.f32.gmra.mxu2 %v604_v62  ;;  %682 = vmatmul.f32.gmra.mxu3 %v608_v63 }
 0x1d8   : > { %646 = vmatmul.f32.gmra.mxu0 %v596_v0  ;;  %658 = vmatmul.f32.gmra.mxu1 %v600_v1 }
 0x1de   : > { %673 = vmatmul.f32.gmra.mxu2 %v605_v2  ;;  %685 = vmatmul.f32.gmra.mxu3 %v609_v3 }
 0x1e0   : > { %649 = vmatmul.f32.gmra.mxu0 %v597_v4  ;;  %661 = vmatmul.f32.gmra.mxu1 %v601_v5 }
 0x1e6   : > { %676 = vmatmul.f32.gmra.mxu2 %v606_v6  ;;  %688 = vmatmul.f32.gmra.mxu3 %v610_v7 }
 0x1e8   : > { %652 = vmatmul.f32.gmra.mxu0 %v598_v8  ;;  %664 = vmatmul.f32.gmra.mxu1 %v602_v9 }
 0x24d   : > { %v644_v12 = vpop.f32.mrf.mxu0  ;;  %v656_v13 = vpop.f32.mrf.mxu1 }
 0x24e   : > { %v692_v14 = vadd.f32 %v644_v12, %v579_v10  ;;  %v696_v15 = vadd.f32 %v656_v13, %v583_v11 }
 0x250   : > { %708 = vst [vmem:[#allocation3 + $0x28] sm:$0xff] %v692_v14 }
 0x251   : > { %712 = vst [vmem:[#allocation3 + $0x48] sm:$0xff] %v696_v15  ;;  %v668_v18 = vpop.f32.mrf.mxu2  ;;  %v680_v19 = vpop.f32.mrf.mxu3 }
 0x252   : > { %v700_v20 = vadd.f32 %v668_v18, %v587_v16  ;;  %v704_v21 = vadd.f32 %v680_v19, %v591_v17 }
 0x254   : > { %716 = vst [vmem:[#allocation3 + $0x20] sm:$0xff] %v700_v20 }
 0x255   : > { %720 = vst [vmem:[#allocation3] sm:$0xff] %v704_v21  ;;  %v647_v24 = vpop.f32.mrf.mxu0  ;;  %v659_v25 = vpop.f32.mrf.mxu1 }
 0x256   : > { %v693_v26 = vadd.f32 %v647_v24, %v580_v22  ;;  %v697_v27 = vadd.f32 %v659_v25, %v584_v23 }
 0x258   : > { %709 = vst [vmem:[#allocation3 + $0x68] sm:$0xff] %v693_v26 }
 0x259   : > { %713 = vst [vmem:[#allocation3 + $0x30] sm:$0xff] %v697_v27  ;;  %v671_v30 = vpop.f32.mrf.mxu2  ;;  %v683_v31 = vpop.f32.mrf.mxu3 }
 0x25a   : > { %v701_v32 = vadd.f32 %v671_v30, %v588_v28  ;;  %v705_v33 = vadd.f32 %v683_v31, %v592_v29 }
 0x25c   : > { %717 = vst [vmem:[#allocation3 + $0x78] sm:$0xff] %v701_v32 }
 0x25d   : > { %721 = vst [vmem:[#allocation3 + $0x8] sm:$0xff] %v705_v33  ;;  %v650_v36 = vpop.f32.mrf.mxu0  ;;  %v662_v37 = vpop.f32.mrf.mxu1 }
 0x25e   : > { %v694_v38 = vadd.f32 %v650_v36, %v581_v34  ;;  %v698_v39 = vadd.f32 %v662_v37, %v585_v35 }
 0x260   : > { %710 = vst [vmem:[#allocation3 + $0x10] sm:$0xff] %v694_v38 }
 0x261   : > { %714 = vst [vmem:[#allocation3 + $0x70] sm:$0xff] %v698_v39  ;;  %v674_v42 = vpop.f32.mrf.mxu2  ;;  %v686_v43 = vpop.f32.mrf.mxu3 }
 0x262   : > { %v702_v44 = vadd.f32 %v674_v42, %v589_v40  ;;  %v706_v45 = vadd.f32 %v686_v43, %v593_v41 }
 0x264   : > { %718 = vst [vmem:[#allocation3 + $0x18] sm:$0xff] %v702_v44 }
 0x265   : > { %722 = vst [vmem:[#allocation3 + $0x60] sm:$0xff] %v706_v45  ;;  %v653_v48 = vpop.f32.mrf.mxu0  ;;  %v665_v49 = vpop.f32.mrf.mxu1 }
 0x266   : > { %v695_v50 = vadd.f32 %v653_v48, %v582_v46  ;;  %v699_v51 = vadd.f32 %v665_v49, %v586_v47 }
 0x268   : > { %711 = vst [vmem:[#allocation3 + $0x40] sm:$0xff] %v695_v50 }
 0x269   : > { %715 = vst [vmem:[#allocation3 + $0x38] sm:$0xff] %v699_v51  ;;  %v677_v54 = vpop.f32.mrf.mxu2  ;;  %v689_v55 = vpop.f32.mrf.mxu3 }
 0x26a   : > { %v703_v56 = vadd.f32 %v677_v54, %v590_v52  ;;  %v707_v57 = vadd.f32 %v689_v55, %v594_v53 }
 0x26c   : > { %719 = vst [vmem:[#allocation3 + $0x58] sm:$0xff] %v703_v56 }
 0x26d   : > { %723 = vst [vmem:[#allocation3 + $0x50] sm:$0xff] %v707_v57 }
 0x26e PF: > { %p724_p11 = scmp.eq.s32.totalorder %s1209_s23, 1 }
 0x270   : > { %p725_p12 = pnand %p724_p11, %p575_p9 }
 0x272   : > { %728 = sbr.rel (%p725_p12) target bundleno = 648 (0x288), region = 52 }
 0x277   : > { %v729_v58 = vld [vmem:[#allocation3 + $0x28] sm:$0xff]  ;;  %v731_v60 = vld [vmem:[#allocation3 + $0x10] sm:$0xff]  ;;  %v732_v61 = vld [vmem:[#allocation3 + $0x40] sm:$0xff] }
 0x278   : > { %v730_v59 = vld [vmem:[#allocation3 + $0x68] sm:$0xff]  ;;  %745 = vst [vmem:[%s1373_s25] sm:$0xff] %v729_v58  ;;  %v734_v63 = vld [vmem:[#allocation3 + $0x30] sm:$0xff]  ;;  %v736_v1 = vld [vmem:[#allocation3 + $0x38] sm:$0xff] }
 0x279   : > { %746 = vst [vmem:[%s1373_s25 + $0x8] sm:$0xff] %v730_v59  ;;  %v733_v62 = vld [vmem:[#allocation3 + $0x48] sm:$0xff]  ;;  %v735_v0 = vld [vmem:[#allocation3 + $0x70] sm:$0xff]  ;;  %v737_v2 = vld [vmem:[#allocation3 + $0x20] sm:$0xff] }
 0x27a   : > { %747 = vst [vmem:[%s1373_s25 + $0x10] sm:$0xff] %v731_v60  ;;  %v738_v3 = vld [vmem:[#allocation3 + $0x78] sm:$0xff]  ;;  %v741_v6 = vld [vmem:[#allocation3] sm:$0xff]  ;;  %v742_v7 = vld [vmem:[#allocation3 + $0x8] sm:$0xff] }
 0x27b   : > { %748 = vst [vmem:[%s1373_s25 + $0x18] sm:$0xff] %v732_v61  ;;  %v739_v4 = vld [vmem:[#allocation3 + $0x18] sm:$0xff]  ;;  %v743_v8 = vld [vmem:[#allocation3 + $0x60] sm:$0xff]  ;;  %v744_v9 = vld [vmem:[#allocation3 + $0x50] sm:$0xff] }
 0x27c   : > { %749 = vst [vmem:[%s1373_s25 + $0x20] sm:$0xff] %v733_v62  ;;  %v740_v5 = vld [vmem:[#allocation3 + $0x58] sm:$0xff] }
 0x27d   : > { %750 = vst [vmem:[%s1373_s25 + $0x28] sm:$0xff] %v734_v63 }
 0x27e   : > { %751 = vst [vmem:[%s1373_s25 + $0x30] sm:$0xff] %v735_v0 }
 0x27f   : > { %752 = vst [vmem:[%s1373_s25 + $0x38] sm:$0xff] %v736_v1 }
 0x280   : > { %753 = vst [vmem:[%s1373_s25 + $0x40] sm:$0xff] %v737_v2 }
 0x281   : > { %754 = vst [vmem:[%s1373_s25 + $0x48] sm:$0xff] %v738_v3 }
 0x282   : > { %755 = vst [vmem:[%s1373_s25 + $0x50] sm:$0xff] %v739_v4 }
 0x283   : > { %756 = vst [vmem:[%s1373_s25 + $0x58] sm:$0xff] %v740_v5 }
 0x284   : > { %757 = vst [vmem:[%s1373_s25 + $0x60] sm:$0xff] %v741_v6 }
 0x285   : > { %758 = vst [vmem:[%s1373_s25 + $0x68] sm:$0xff] %v742_v7 }
 0x286   : > { %759 = vst [vmem:[%s1373_s25 + $0x70] sm:$0xff] %v743_v8 }
 0x287   : > { %760 = vst [vmem:[%s1373_s25 + $0x78] sm:$0xff] %v744_v9 }
 0x288 PF: > { %s934_s22 = sshll.u32 %s1213_s24, 7  ;;  %s774_s15 = sshll.u32 %s1373_s25, 4  ;;  %s775_s15 = int_to_ptr.vmem [resolvable:$true] %s774_s15 }
 0x289   : > { %s773_s14 = scalar_lea.hbm %s1556_s4, %s934_s22  ;;  %s1570_s17 = sand.u32 1, %s1197_s20  }
 0x28a   : > { %s776_s16 = sshll.u32 %s773_s14, 4  ;;  %s762_s18 = scalar_lea.sflag [#allocation7], %s1570_s17  ;;  %s777_s16 = int_to_ptr.hbm [resolvable:$true] %s776_s16 }
 0x28b   : > { %s1131_s28 = sshra.s32 %s777_s16, 4  ;;  %s1137_s24 = scalar_lea.hbm %s1556_s4, 256  ;;  %s1132_s28 = int_to_ptr.hbm [resolvable:$true] %s1131_s28 }
 0x28c   : > { %s1133_s29 = scalar_lea.hbm %s1132_s28, 128  ;;  %p1138_p2 = scmp.lt.s32.totalorder %s1132_s28, %s1556_s4 }
 0x28d   : > { %p1134_p13 = scmp.ne.s32.totalorder %s1132_s28, %s1133_s29  ;;  %p1139_p3 = scmp.lt.s32.totalorder %s1137_s24, %s1133_s29 }
 0x28f   : > { %p1135_p0 = pnand %p1134_p13, %p1328_p6  ;;  %p1140_p4 = por %p1139_p3, %p1138_p2 }
 0x291   : > { %p1136_p1 = pneg %p1135_p0 }
 0x293   : > { %p1141_p5 = pnand %p1140_p4, %p1136_p1 }
 0x295   : > { %1144 = shalt.err (!%p1141_p5)
}
 0x296   : > { %s1236_s25 = smov 128   ;;  %s1237_s5 = smov 8  }
 0x297   : > { %1007 = dma.vmem_to_hbm [thread:$0]  (%p1328_p6), %s775_s15, 2048, %s777_s16, %s762_s18, %s1236_s25, %s1236_s25, %s1237_s5  }
 0x298 PF: > { %p1013_p7 = scmp.ge.s32.totalorder %s1229_s27, 2  ;;  %s791_s6 = sand.u32 1, %s1193_s19  }
 0x299   : > { %s792_s12 = scalar_lea.sflag [#allocation7], %s791_s6 }
 0x29a   : > { %p1010_p9 = pnand %p1013_p7, %p1336_p8 }
 0x29c   : > { %p1011_p10 = pneg %p1010_p9 }
 0x29e   : > { %1188 = dma.done.wait (%p1011_p10), %s792_s12, 2048  }
 0x29f   : > { %1190 = vsyncadd (%p1011_p10), %s792_s12, 4294965248  ;;  %s25_s27 = sadd.s32 1, %s1229_s27   ;;  %s1571_s23 = sld [smem:[#allocation10_spill]] }
 0x2a0   : > { %p22_p11 = scmp.ge.s32.totalorder %s25_s27, 34   ;;  %s1572_s24 = sld [smem:[#allocation11_spill]] }
 0x2a1   : > { %s1573_s7 = sld [smem:[#allocation12_spill]]  ;;  %s1576_s19 = smov %s1197_s20 }
 0x2a2   : > { %s1574_s25 = sld [smem:[#allocation13_spill]]  ;;  %s1577_s20 = smov %s1201_s21 }
 0x2a3   : > { %s1575_s26 = sld [smem:[#allocation14_spill]]  ;;  %s1578_s21 = smov %s1347_s11 }
 0x2a4   : > { %s1579_s22 = smov %s1217_s0  ;;  %24 = sbr.rel (!%p22_p11) target bundleno = 12 (0xc), region = 93 }
 0x2a7   : > { %s1580_s0 = smov %s1573_s7 }
 0x2a9   :  { %798 = vsyncpa [#allocation7], 1 }
 0x2aa   :  { %800 = vsyncpa [#allocation7 + $0x1], 1 }

</bundles_post_ra>
